<compile_context>
chip_gen: v5e
topology: v5e:2x2
jax: 0.10.0
libtpu: 0.0.40
codegen_flags: <defaults>
</compile_context>

<pallas_src>
import functools

import jax
import jax.numpy as jnp
from jax import lax
from jax.experimental import pallas as pl
from jax.experimental.pallas import tpu as pltpu


def _round_up(x, m):
    return (x + m - 1) // m * m


# --------------------------------------------------------------------------------------
# Pass 1: conv (im2col matmul) + per-channel sum / sum-of-squares accumulators
# --------------------------------------------------------------------------------------
def _conv_stats_kernel(pT_ref, wT_ref, y_ref, sum_ref, ssq_ref):
    @pl.when(pl.program_id(0) == 0)
    def _init():
        sum_ref[...] = jnp.zeros_like(sum_ref)
        ssq_ref[...] = jnp.zeros_like(ssq_ref)

    # [Cout_pad, K_pad] @ [K_pad, TM] -> [Cout_pad, TM]  (lane dim = TM, dense)
    y = jnp.dot(wT_ref[...], pT_ref[...], preferred_element_type=jnp.float32)
    y_ref[...] = y

    # Per-channel statistics (zero-padded M columns contribute 0 to both sums).
    sum_ref[...] += jnp.sum(y, axis=1, keepdims=True)
    ssq_ref[...] += jnp.sum(y * y, axis=1, keepdims=True)


# --------------------------------------------------------------------------------------
# Pass 2: fused BatchNorm (pre-folded scale/shift) + ReLU
# --------------------------------------------------------------------------------------
def _bn_relu_kernel(y_ref, scale_ref, shift_ref, o_ref):
    o_ref[...] = jnp.maximum(
        y_ref[...] * scale_ref[...] + shift_ref[...], 0.0).astype(o_ref.dtype)


def _im2col_T(x_nchw, kh, kw, *, stride, pad, dtype):
    """x: [N, Cin, H, W] -> transposed patches [Cin*kh*kw, N*OH*OW].

    K-row ordering is (c_in, kh, kw) with kw fastest (matches PyTorch weight
    flattening); M-column ordering is (n, oh, ow)."""
    n, cin, h, w = x_nchw.shape
    oh = (h + 2 * pad - kh) // stride + 1
    ow = (w + 2 * pad - kw) // stride + 1
    xp = jnp.pad(x_nchw.astype(dtype), ((0, 0), (0, 0), (pad, pad), (pad, pad)))
    cols = []
    for i in range(kh):
        for j in range(kw):
            cols.append(xp[:, :, i:i + stride * oh:stride, j:j + stride * ow:stride])
    # [kh*kw, N, Cin, OH, OW] -> [Cin, kh*kw, N, OH, OW] -> [K, M]
    pat = jnp.stack(cols, axis=0).transpose(2, 0, 1, 3, 4)
    return pat.reshape(cin * kh * kw, n * oh * ow), oh, ow


def encoder_block(x, conv_w, conv_b, bn_gamma, bn_beta, *,
                  eps=1e-5, compute_dtype=jnp.bfloat16, tile_m=512):
    """Forward of EncoderBlock.  x: [N, Cin, H, W] (NCHW) -> [N, Cout, OH, OW]."""
    n, cin, h, w = x.shape
    cout, cin_w, kh, kw = conv_w.shape
    assert cin == cin_w
    # Conv bias cancels exactly under train-mode BatchNorm (absorbed into the batch
    # mean), so it is dropped from the kernel entirely.
    del conv_b

    # Transposed im2col so M (large) is the lane dimension of the matmul output.
    patT, oh, ow = _im2col_T(x, kh, kw, stride=2, pad=1, dtype=compute_dtype)
    k, m = patT.shape

    k_pad = _round_up(k, 128)                  # full, unmasked MXU feed rows
    cout_pad = _round_up(cout, 8)              # sublane dim only needs /8
    tm = min(int(tile_m), _round_up(m, 128))   # lane-dense M tile (multiple of 128)
    m_pad = _round_up(m, tm)
    grid_m = m_pad // tm

    patT = jnp.pad(patT, ((0, k_pad - k), (0, m_pad - m)))
    wT = jnp.pad(conv_w.reshape(cout, k).astype(compute_dtype),
                 ((0, cout_pad - cout), (0, k_pad - k)))

    itemsize = jnp.dtype(compute_dtype).itemsize
    cost = pl.CostEstimate(
        flops=2 * m_pad * k_pad * cout_pad,
        transcendentals=0,
        bytes_accessed=(patT.size * itemsize + wT.size * itemsize
                        + cout_pad * m_pad * 4),
    )
    vmem_limit = 48 * 1024 * 1024   # explicit budget; headroom under v7x's 64 MiB VMEM

    # ---------------- Pass 1: tiled matmul + batch-stat accumulation ----------------
    yT, ssum, ssq = pl.pallas_call(
        _conv_stats_kernel,
        out_shape=(
            jax.ShapeDtypeStruct((cout_pad, m_pad), jnp.float32),
            jax.ShapeDtypeStruct((cout_pad, 1), jnp.float32),
            jax.ShapeDtypeStruct((cout_pad, 1), jnp.float32),
        ),
        grid_spec=pltpu.PrefetchScalarGridSpec(
            num_scalar_prefetch=0,
            grid=(grid_m,),
            in_specs=[
                pl.BlockSpec((k_pad, tm), lambda i: (0, i)),        # patches tile
                pl.BlockSpec((cout_pad, k_pad), lambda i: (0, 0)),  # weights (resident)
            ],
            out_specs=[
                pl.BlockSpec((cout_pad, tm), lambda i: (0, i)),     # conv output tile
                pl.BlockSpec((cout_pad, 1), lambda i: (0, 0)),      # sum accumulator
                pl.BlockSpec((cout_pad, 1), lambda i: (0, 0)),      # sumsq accumulator
            ],
        ),
        compiler_params=pltpu.CompilerParams(
            dimension_semantics=("arbitrary",),    # stats accumulate across M tiles
            vmem_limit_bytes=vmem_limit),
        cost_estimate=cost,
    )(patT, wT)

    # Fold BatchNorm (+ ReLU epilogue params) into one per-channel scale/shift.
    m_f = jnp.float32(m)                               # true M (padding adds zeros only)
    mean = ssum[:, 0] / m_f
    var = jnp.maximum(ssq[:, 0] / m_f - mean * mean, 0.0)   # biased train-mode variance
    gamma = jnp.pad(bn_gamma.astype(jnp.float32), (0, cout_pad - cout))
    beta = jnp.pad(bn_beta.astype(jnp.float32), (0, cout_pad - cout))
    inv_std = lax.rsqrt(var + eps)
    scale_flat = gamma * inv_std
    scale = scale_flat.reshape(cout_pad, 1)
    shift = (beta - mean * scale_flat).reshape(cout_pad, 1)

    # ---------------- Pass 2: lane-dense scale/shift + ReLU --------------------------
    outT = pl.pallas_call(
        _bn_relu_kernel,
        out_shape=jax.ShapeDtypeStruct((cout_pad, m_pad), jnp.float32),
        grid_spec=pltpu.PrefetchScalarGridSpec(
            num_scalar_prefetch=0,
            grid=(grid_m,),
            in_specs=[
                pl.BlockSpec((cout_pad, tm), lambda i: (0, i)),
                pl.BlockSpec((cout_pad, 1), lambda i: (0, 0)),
                pl.BlockSpec((cout_pad, 1), lambda i: (0, 0)),
            ],
            out_specs=pl.BlockSpec((cout_pad, tm), lambda i: (0, i)),
        ),
        compiler_params=pltpu.CompilerParams(
            dimension_semantics=("parallel",),     # independent tiles (megacore on v7x)
            vmem_limit_bytes=vmem_limit),
    )(yT, scale, shift)

    # [Cout_pad, M_pad] -> [N, Cout, OH, OW]
    out = outT[:cout, :m].reshape(cout, n, oh, ow).transpose(1, 0, 2, 3)
    return out.astype(x.dtype)


def _reference(x, conv_w, conv_b, bn_gamma, bn_beta, eps=1e-5):
    y = lax.conv_general_dilated(
        x.astype(jnp.float32), conv_w.astype(jnp.float32),
        window_strides=(2, 2), padding=((1, 1), (1, 1)),
        dimension_numbers=("NCHW", "OIHW", "NCHW"))
    y = y + conv_b.reshape(1, -1, 1, 1)
    mean = jnp.mean(y, axis=(0, 2, 3), keepdims=True)
    var = jnp.mean((y - mean) ** 2, axis=(0, 2, 3), keepdims=True)
    y = (y - mean) / jnp.sqrt(var + eps)
    y = bn_gamma.reshape(1, -1, 1, 1) * y + bn_beta.reshape(1, -1, 1, 1)
    return jnp.maximum(y, 0.0)


if __name__ == "__main__":
    in_channels, out_channels = 4, 8
    N, H, W = 2, 16, 16

    key = jax.random.PRNGKey(0)
    kx, kw, kb = jax.random.split(key, 3)

    x = jax.random.normal(kx, (N, in_channels, H, W), dtype=jnp.float32)
    conv_w = 0.1 * jax.random.normal(kw, (out_channels, in_channels, 4, 4), dtype=jnp.float32)
    conv_b = 0.05 * jax.random.normal(kb, (out_channels,), dtype=jnp.float32)
    bn_gamma = jnp.ones((out_channels,), dtype=jnp.float32)
    bn_beta = jnp.zeros((out_channels,), dtype=jnp.float32)

    ref = _reference(x, conv_w, conv_b, bn_gamma, bn_beta)

    # f32 MXU feed (tight tolerance sanity check).
    out_f32 = jax.block_until_ready(
        encoder_block(x, conv_w, conv_b, bn_gamma, bn_beta, compute_dtype=jnp.float32))
    assert out_f32.shape == (N, out_channels, H // 2, W // 2), out_f32.shape
    assert jnp.allclose(out_f32, ref, atol=1e-3, rtol=1e-3), \
        float(jnp.max(jnp.abs(out_f32 - ref)))

    # bf16 MXU feed (default, v6e/v7x perf path) — looser tolerance.
    out_bf16 = jax.block_until_ready(
        encoder_block(x, conv_w, conv_b, bn_gamma, bn_beta, compute_dtype=jnp.bfloat16))
    assert out_bf16.shape == (N, out_channels, H // 2, W // 2), out_bf16.shape
    assert jnp.allclose(out_bf16, ref, atol=7e-2, rtol=7e-2), \
        float(jnp.max(jnp.abs(out_bf16 - ref)))

    print("KERNEL_OK")
</pallas_src>

<mosaic_0001>
module attributes {stable_mosaic.version = 11 : i64} {
  func.func @_conv_stats_kernel(%arg0: i32, %arg1: memref<128x128xf32, #tpu.memory_space<vmem>>, %arg2: memref<8x128xf32, #tpu.memory_space<vmem>>, %arg3: memref<8x128xf32, #tpu.memory_space<vmem>>, %arg4: memref<8x1xf32, #tpu.memory_space<vmem>>, %arg5: memref<8x1xf32, #tpu.memory_space<vmem>>) attributes {dimension_semantics = [#tpu.dimension_semantics<arbitrary>], iteration_bounds = array<i64: 1>, scalar_prefetch = 0 : i64, scratch_operands = 0 : i64, tpu.core_type = #tpu.core_type<tc>, window_params = [{transform_indices = @transform_0, window_bounds = array<i64: 128, 128>}, {pipeline_mode = #tpu.pipeline_mode<synchronous>, transform_indices = @transform_1, window_bounds = array<i64: 8, 128>}, {transform_indices = @transform_2, window_bounds = array<i64: 8, 128>}, {pipeline_mode = #tpu.pipeline_mode<synchronous>, transform_indices = @transform_3, window_bounds = array<i64: 8, 1>}, {pipeline_mode = #tpu.pipeline_mode<synchronous>, transform_indices = @transform_4, window_bounds = array<i64: 8, 1>}]} {
    %c0_i32 = arith.constant 0 : i32
    %0 = arith.cmpi eq, %arg0, %c0_i32 : i32
    %1 = arith.extui %0 : i1 to i32
    %c0_i32_0 = arith.constant 0 : i32
    %2 = arith.cmpi ne, %1, %c0_i32_0 : i32
    scf.if %2 {
      %cst_16 = arith.constant 0.000000e+00 : f32
      %18 = vector.broadcast %cst_16 : f32 to vector<8x1xf32>
      %c0_17 = arith.constant 0 : index
      %c0_18 = arith.constant 0 : index
      %19 = vector.load %arg4[%c0_17, %c0_18] : memref<8x1xf32, #tpu.memory_space<vmem>>, vector<8x1xf32>
      tpu.vector_store %arg4[%c0_17, %c0_18], %18 {strides = array<i32>} : memref<8x1xf32, #tpu.memory_space<vmem>>, vector<8x1xf32>,
      %cst_19 = arith.constant 0.000000e+00 : f32
      %20 = vector.broadcast %cst_19 : f32 to vector<8x1xf32>
      %c0_20 = arith.constant 0 : index
      %c0_21 = arith.constant 0 : index
      %21 = vector.load %arg5[%c0_20, %c0_21] : memref<8x1xf32, #tpu.memory_space<vmem>>, vector<8x1xf32>
      tpu.vector_store %arg5[%c0_20, %c0_21], %20 {strides = array<i32>} : memref<8x1xf32, #tpu.memory_space<vmem>>, vector<8x1xf32>,
    } else {
    }
    %c0 = arith.constant 0 : index
    %c0_1 = arith.constant 0 : index
    %3 = vector.load %arg2[%c0, %c0_1] : memref<8x128xf32, #tpu.memory_space<vmem>>, vector<8x128xf32>
    %c0_2 = arith.constant 0 : index
    %c0_3 = arith.constant 0 : index
    %4 = vector.load %arg1[%c0_2, %c0_3] : memref<128x128xf32, #tpu.memory_space<vmem>>, vector<128x128xf32>
    %cst = arith.constant dense<0.000000e+00> : vector<8x128xf32>
    %5 = tpu.matmul %3, %4, %cst {dimension_numbers = #tpu.dot_dimension_numbers<[1], [0], [0], [1], [0, 0, 1, 1], [], []>} : vector<8x128xf32>, vector<128x128xf32>, vector<8x128xf32> -> vector<8x128xf32>
    %c0_4 = arith.constant 0 : index
    %c0_5 = arith.constant 0 : index
    %6 = vector.load %arg3[%c0_4, %c0_5] : memref<8x128xf32, #tpu.memory_space<vmem>>, vector<8x128xf32>
    tpu.vector_store %arg3[%c0_4, %c0_5], %5 {strides = array<i32>} : memref<8x128xf32, #tpu.memory_space<vmem>>, vector<8x128xf32>,
    %c0_6 = arith.constant 0 : index
    %c0_7 = arith.constant 0 : index
    %7 = vector.load %arg4[%c0_6, %c0_7] : memref<8x1xf32, #tpu.memory_space<vmem>>, vector<8x1xf32>
    %cst_8 = arith.constant dense<0.000000e+00> : vector<8xf32>
    %8 = vector.multi_reduction <add>, %5, %cst_8 [1] : vector<8x128xf32> to vector<8xf32>
    %9 = vector.shape_cast %8 : vector<8xf32> to vector<8x1xf32>
    %10 = arith.addf %7, %9 : vector<8x1xf32>
    %c0_9 = arith.constant 0 : index
    %c0_10 = arith.constant 0 : index
    %11 = vector.load %arg4[%c0_9, %c0_10] : memref<8x1xf32, #tpu.memory_space<vmem>>, vector<8x1xf32>
    tpu.vector_store %arg4[%c0_9, %c0_10], %10 {strides = array<i32>} : memref<8x1xf32, #tpu.memory_space<vmem>>, vector<8x1xf32>,
    %c0_11 = arith.constant 0 : index
    %c0_12 = arith.constant 0 : index
    %12 = vector.load %arg5[%c0_11, %c0_12] : memref<8x1xf32, #tpu.memory_space<vmem>>, vector<8x1xf32>
    %13 = arith.mulf %5, %5 : vector<8x128xf32>
    %cst_13 = arith.constant dense<0.000000e+00> : vector<8xf32>
    %14 = vector.multi_reduction <add>, %13, %cst_13 [1] : vector<8x128xf32> to vector<8xf32>
    %15 = vector.shape_cast %14 : vector<8xf32> to vector<8x1xf32>
    %16 = arith.addf %12, %15 : vector<8x1xf32>
    %c0_14 = arith.constant 0 : index
    %c0_15 = arith.constant 0 : index
    %17 = vector.load %arg5[%c0_14, %c0_15] : memref<8x1xf32, #tpu.memory_space<vmem>>, vector<8x1xf32>
    tpu.vector_store %arg5[%c0_14, %c0_15], %16 {strides = array<i32>} : memref<8x1xf32, #tpu.memory_space<vmem>>, vector<8x1xf32>,
    return
  }
  func.func @transform_0(%arg0: i32) -> (i32, i32) {
    %c0_i32 = arith.constant 0 : i32
    %c0_i32_0 = arith.constant 0 : i32
    return %c0_i32, %arg0 : i32, i32
  }
  func.func @transform_1(%arg0: i32) -> (i32, i32) {
    %c0_i32 = arith.constant 0 : i32
    %c0_i32_0 = arith.constant 0 : i32
    %c0_i32_1 = arith.constant 0 : i32
    return %c0_i32, %c0_i32_0 : i32, i32
  }
  func.func @transform_2(%arg0: i32) -> (i32, i32) {
    %c0_i32 = arith.constant 0 : i32
    %c0_i32_0 = arith.constant 0 : i32
    return %c0_i32, %arg0 : i32, i32
  }
  func.func @transform_3(%arg0: i32) -> (i32, i32) {
    %c0_i32 = arith.constant 0 : i32
    %c0_i32_0 = arith.constant 0 : i32
    %c0_i32_1 = arith.constant 0 : i32
    return %c0_i32, %c0_i32_0 : i32, i32
  }
  func.func @transform_4(%arg0: i32) -> (i32, i32) {
    %c0_i32 = arith.constant 0 : i32
    %c0_i32_0 = arith.constant 0 : i32
    %c0_i32_1 = arith.constant 0 : i32
    return %c0_i32, %c0_i32_0 : i32, i32
  }
}

</mosaic_0001>

<bundles_post_ra>
// kernel: tpu_custom_call.1
= control target key start
LH: loop header
LB: loop body
LE: loop exit
PB: predicated region body
PF: predicated region fallthrough
CT: control target
= control target key end

     0   :  { %10 = vsyncpa [#allocation3], 0  ;;  %s274_s0 = inlined_call_operand.hbm [shape: f32[128,128], index: 0, kind: input, shape index: {}]   ;;  %s275_s1 = inlined_call_operand.hbm [shape: f32[8,128], index: 1, kind: input, shape index: {}]   ;;  %s276_s2 = inlined_call_operand.hbm [shape: f32[8,128], index: 2, kind: output, shape index: {0}]   ;;  %s277_s3 = inlined_call_operand.vmem [shape: f32[8,1], index: 3, kind: output, shape index: {1}]   ;;  %s278_s4 = inlined_call_operand.vmem [shape: f32[8,1], index: 4, kind: output, shape index: {2}]  }
   0x1   :  { %11 = vsyncpa [#allocation6], 0 }
   0x2   :  { %12 = vsyncpa [#allocation4], 0  ;;  %s17_s17 = sshll.u32 %s274_s0, 4  ;;  %s212_s18 = smov [#allocation2]   ;;  %s18_s17 = int_to_ptr.hbm [resolvable:$true] %s17_s17 }
   0x3   :  { %s19_s19 = sshll.u32 %s212_s18, 4  ;;  %s31_s22 = sshll.u32 %s275_s1, 4  ;;  %s20_s19 = int_to_ptr.vmem [resolvable:$true] %s19_s19  ;;  %s32_s22 = int_to_ptr.hbm [resolvable:$true] %s31_s22 }
   0x4   :  { %s213_s23 = smov 128   ;;  %s214_s24 = smov 8  }
   0x5   :  { %25 = dma.hbm_to_vmem [thread:$0]  %s18_s17, 2048, %s20_s19, [#allocation3], %s213_s23, %s213_s23, %s214_s24  }
   0x6   :  { %s215_s25 = smov [#allocation5]  }
   0x7   :  { %s33_s26 = sshll.u32 %s215_s25, 4  ;;  %s34_s26 = int_to_ptr.vmem [resolvable:$true] %s33_s26 }
   0x8   :  { %36 = dma.hbm_to_vmem [thread:$0]  %s32_s22, 128, %s34_s26, [#allocation6]  }
   0x9   :  { %206 = dma.done.wait [#allocation3], 2048  }
   0xa   :  { %207 = vsyncadd [#allocation3], 4294965248 }
   0xb   :  { %208 = dma.done.wait [#allocation6], 128  }
   0xc   :  { %209 = vsyncadd [#allocation6], 4294967168  ;;  %v68_v0 = vld [vmem:[#allocation2 + $0x78] sm:$0xff]  ;;  %v67_v1 = vld [vmem:[#allocation2 + $0x70] sm:$0xff]  ;;  %vm49_vm0 = vcmask 7168   ;;  %v216_v17 = vmov 0.0  }
   0xd   :  { %69 = vmatpush.msra.mxu0 %v68_v0  ;;  %v66_v2 = vld [vmem:[#allocation2 + $0x68] sm:$0xff]  ;;  %v65_v3 = vld [vmem:[#allocation2 + $0x60] sm:$0xff]  ;;  %v64_v4 = vld [vmem:[#allocation2 + $0x58] sm:$0xff]  ;;  %50 = vst.msk [vmem:[%s277_s3] sm:$0xff] %vm49_vm0, %v216_v17  ;;  %s217_s29 = smov [#allocation7]   ;;  %s109_s7 = sshll.u32 %s276_s2, 4  ;;  %s110_s7 = int_to_ptr.hbm [resolvable:$true] %s109_s7 }
   0xe   :  { %v63_v5 = vld [vmem:[#allocation2 + $0x50] sm:$0xff]  ;;  %v62_v6 = vld [vmem:[#allocation2 + $0x48] sm:$0xff]  ;;  %v61_v7 = vld [vmem:[#allocation2 + $0x40] sm:$0xff]  ;;  %51 = vst.msk [vmem:[%s278_s4] sm:$0xff] %vm49_vm0, %v216_v17  ;;  %s107_s30 = sshll.u32 %s217_s29, 4  ;;  %s108_s30 = int_to_ptr.vmem [resolvable:$true] %s107_s30 }
   0xf   :  { %70 = vmatpush.msra.mxu0 %v67_v1  ;;  %v60_v8 = vld [vmem:[#allocation2 + $0x38] sm:$0xff]  ;;  %v59_v9 = vld [vmem:[#allocation2 + $0x30] sm:$0xff]  ;;  %v58_v10 = vld [vmem:[#allocation2 + $0x28] sm:$0xff] }
  0x10   :  { %v57_v11 = vld [vmem:[#allocation2 + $0x20] sm:$0xff]  ;;  %v56_v12 = vld [vmem:[#allocation2 + $0x18] sm:$0xff]  ;;  %v55_v13 = vld [vmem:[#allocation2 + $0x10] sm:$0xff] }
  0x11   :  { %71 = vmatpush.msra.mxu0 %v66_v2  ;;  %v54_v14 = vld [vmem:[#allocation2 + $0x8] sm:$0xff]  ;;  %v53_v15 = vld [vmem:[#allocation2] sm:$0xff] }
  0x12   :  { %v52_v16 = vld [vmem:[#allocation5] sm:$0xff] }
  0x13   :  { %72 = vmatpush.msra.mxu0 %v65_v3 }
  0x14   :  { %v90_v20 = vld [vmem:[%s277_s3] sm:$0xff] }
  0x15   :  { %73 = vmatpush.msra.mxu0 %v64_v4  ;;  %v96_v23 = vld [vmem:[%s278_s4] sm:$0xff] }
  0x17   :  { %74 = vmatpush.msra.mxu0 %v63_v5 }
  0x19   :  { %75 = vmatpush.msra.mxu0 %v62_v6 }
  0x1b   :  { %76 = vmatpush.msra.mxu0 %v61_v7 }
  0x1d   :  { %77 = vmatpush.msra.mxu0 %v60_v8 }
  0x1f   :  { %78 = vmatpush.msra.mxu0 %v59_v9 }
  0x21   :  { %79 = vmatpush.msra.mxu0 %v58_v10 }
  0x23   :  { %80 = vmatpush.msra.mxu0 %v57_v11 }
  0x25   :  { %81 = vmatpush.msra.mxu0 %v56_v12 }
  0x27   :  { %82 = vmatpush.msra.mxu0 %v55_v13 }
  0x29   :  { %83 = vmatpush.msra.mxu0 %v54_v14 }
  0x2b   :  { %84 = vmatpush.msra.mxu0 %v53_v15 }
  0x2c   :  { %85 = vmatmul.f32.vlgmr.msra.gmra.mxu0 %v52_v16 }
  0xa9   :  { %v86_v18 = vpop.f32.mrf.mxu0 }
  0xaa   :  { %89 = vst [vmem:[#allocation7] sm:$0xff] %v86_v18  ;;  %91 = vadd.xlane.f32.xlu0 %v86_v18  ;;  %v97_v19 = vmul.f32 %v86_v18, %v86_v18 }
  0xab   :  { %112 = dma.vmem_to_hbm [thread:$0]  %s108_s30, 128, %s110_s7, [#allocation4]  }
  0xb2   :  { %98 = vadd.xlane.f32.xlu0 %v97_v19 }
 0x11d   :  { %v92_v21 = vpop.xlane.xlu0 %91 }
 0x11e   :  { %v93_v22 = vadd.f32 %v92_v21, %v90_v20 }
 0x120   :  { %95 = vst.msk [vmem:[%s277_s3] sm:$0xff] %vm49_vm0, %v93_v22 }
 0x125   :  { %v99_v24 = vpop.xlane.xlu0 %98 }
 0x126   :  { %v100_v25 = vadd.f32 %v99_v24, %v96_v23 }
 0x128   :  { %101 = vst.msk [vmem:[%s278_s4] sm:$0xff] %vm49_vm0, %v100_v25 }
 0x129   :  { %210 = dma.done.wait [#allocation4], 128  }
 0x12a   :  { %211 = vsyncadd [#allocation4], 4294967168 }
 0x12b   :  { %125 = vsyncpa [#allocation3], 1 }
 0x12c   :  { %126 = vsyncpa [#allocation6], 1 }
 0x12d   :  { %127 = vsyncpa [#allocation4], 1 }

</bundles_post_ra>
